<compile_context>
chip_gen: v7x
topology: tpu7x:2x2x1
jax: 0.10.0
libtpu: 0.0.40
codegen_flags: <defaults>
</compile_context>

<pallas_src>
import math

import jax
import jax.numpy as jnp
from jax import lax
from jax.experimental import pallas as pl
from jax.experimental.pallas import tpu as pltpu


LN_EPS = 1e-5  # PyTorch nn.LayerNorm default


# --------------------------------------------------------------------------- #
# Kernels
# --------------------------------------------------------------------------- #
def _kernel_f32(x_ref, y_ref, g_ref, b_ref, o_ref):
    """f32 compute path (default; used for f32 I/O and on chips w/o bf16 VPU)."""
    x = x_ref[...].astype(jnp.float32)
    y = y_ref[...].astype(jnp.float32)
    u = x - jnp.maximum(y, 0.0)

    # LayerNorm over last dim (biased variance, eps inside rsqrt — PyTorch semantics).
    mean = jnp.mean(u, axis=-1, keepdims=True)
    centered = u - mean
    var = jnp.mean(centered * centered, axis=-1, keepdims=True)
    inv_std = lax.rsqrt(var + LN_EPS)

    # gamma/beta are (1, H) f32 whole-array VMEM operands, broadcast over rows.
    o_ref[...] = (centered * inv_std * g_ref[...] + b_ref[...]).astype(o_ref.dtype)


def _make_kernel_lowp(inv_h):
    """16-bit elementwise path (v7x): prologue/epilogue stay in the input dtype
    (packed 2/lane on the VPU); mean/var/rsqrt accumulate in f32."""
    inv_h = float(inv_h)

    def kernel(x_ref, y_ref, g_ref, b_ref, o_ref):
        u = x_ref[...] - jnp.maximum(y_ref[...], 0.0)          # 16-bit elementwise
        uf = u.astype(jnp.float32)                              # feeds the reductions only
        s1 = jnp.sum(uf, axis=-1, keepdims=True)
        s2 = jnp.sum(uf * uf, axis=-1, keepdims=True)
        mean = s1 * inv_h
        var = jnp.maximum(s2 * inv_h - mean * mean, 0.0)        # single pass, clamped
        inv_std = lax.rsqrt(var + LN_EPS)
        mean_l = mean.astype(u.dtype)
        inv_l = inv_std.astype(u.dtype)
        # epilogue in the 16-bit dtype; gamma/beta are (1, H) in the same dtype.
        o_ref[...] = (((u - mean_l) * inv_l) * g_ref[...] + b_ref[...]).astype(o_ref.dtype)

    return kernel


# --------------------------------------------------------------------------- #
# Wrapper helpers
# --------------------------------------------------------------------------- #
def _round_up(n, m):
    return ((n + m - 1) // m) * m


def _sublane_multiple(dtype) -> int:
    # sublane packing: 8 rows for 32-bit, 16 for 16-bit, 32 for 8-bit dtypes.
    return {4: 8, 2: 16, 1: 32}.get(jnp.dtype(dtype).itemsize, 8)


def _tpu_vmem_capacity_bytes() -> int:
    try:
        info = pltpu.get_tpu_info()
        cap = getattr(info, "vmem_capacity_bytes", None)
        if cap:
            return int(cap)
    except Exception:
        pass
    return 128 * 1024 * 1024  # assume v5e/v6e-style VMEM if the query is unavailable


def _choose_row_block(rows, bytes_per_row, sub, target_block_bytes):
    rb = max(sub, (target_block_bytes // max(bytes_per_row, 1)) // sub * sub)
    rb = min(rb, _round_up(rows, sub))
    # >= 4 grid steps (>= 2 per v7x TensorCore) whenever there are enough rows.
    if rows >= 4 * sub and pl.cdiv(rows, rb) < 4:
        rb = max(sub, _round_up(pl.cdiv(rows, 4), sub))
    # Prefer an even number of grid steps so both v7x cores get balanced work.
    g = pl.cdiv(rows, rb)
    if g > 1 and g % 2 == 1:
        rb_even = max(sub, _round_up(pl.cdiv(rows, g + 1), sub))
        if pl.cdiv(rows, rb_even) % 2 == 0:
            rb = rb_even
    return rb


def _vmem_bytes_needed(rb, H, io_itemsize, in_bufs):
    blk_io = rb * H * io_itemsize
    io = 2 * in_bufs * blk_io + 2 * blk_io       # x,y (in_bufs-deep) + out (2-deep)
    f32_tmps = 4 * rb * H * 4                    # elementwise temporaries in VMEM scratch
    params = 4 * H * 4                           # gamma/beta (+ slack below)
    return io + f32_tmps + params + (2 << 20)


# --------------------------------------------------------------------------- #
# Public entry point
# --------------------------------------------------------------------------- #
def residual_decomp(x, y, gamma, beta):
    """LayerNorm(x - relu(y)) over the last dim.  x, y: (..., H); gamma, beta: (H,)."""
    assert x.shape == y.shape
    H = x.shape[-1]
    assert gamma.shape == (H,) and beta.shape == (H,)

    orig_shape = x.shape
    rows = math.prod(orig_shape[:-1]) if len(orig_shape) > 1 else 1
    x2 = x.reshape(rows, H)
    y2 = y.reshape(rows, H)

    itemsize = jnp.dtype(x2.dtype).itemsize
    sub = _sublane_multiple(x2.dtype)

    # ---- generation-aware sizing -------------------------------------------
    vmem_phys = _tpu_vmem_capacity_bytes()
    small_vmem = vmem_phys <= 80 * 1024 * 1024          # v7x: 64 MiB per TensorCore
    target_block_bytes = (5 << 20) // 2 if small_vmem else (6 << 20)
    vmem_cap = (48 << 20) if small_vmem else (80 << 20)
    low_precision = small_vmem and itemsize == 2        # 16-bit elementwise path on v7x
    # TODO(synk): also enable the 16-bit elementwise path on v6e once the chip
    # generation (not just VMEM size) is reliably queryable; v5e has no bf16 VPU.

    rb = _choose_row_block(rows, H * itemsize, sub, target_block_bytes)
    # Shrink the tile until the full budget (I/O buffers + f32 temporaries) fits.
    while _vmem_bytes_needed(rb, H, itemsize, 3) > vmem_cap and rb > sub:
        rb = max(sub, (rb // 2) // sub * sub)
    grid0 = pl.cdiv(rows, rb)
    in_bufs = 3 if (grid0 >= 4 and rb * H * itemsize <= (4 << 20)) else 2
    vmem_limit = int(min(max(_vmem_bytes_needed(rb, H, itemsize, in_bufs), 32 << 20),
                         vmem_cap))

    # ---- affine params: cast once here, resident whole-array in VMEM ----------
    param_dtype = x2.dtype if low_precision else jnp.float32
    g2 = gamma.astype(param_dtype).reshape(1, H)
    b2 = beta.astype(param_dtype).reshape(1, H)

    kernel = _make_kernel_lowp(1.0 / H) if low_precision else _kernel_f32

    def _run(n_in_bufs):
        def io_spec():
            if n_in_bufs > 2:
                return pl.BlockSpec((rb, H), lambda i: (i, 0),
                                    pipeline_mode=pl.Buffered(n_in_bufs))
            return pl.BlockSpec((rb, H), lambda i: (i, 0))

        return pl.pallas_call(
            kernel,
            out_shape=jax.ShapeDtypeStruct((rows, H), x2.dtype),
            grid_spec=pltpu.PrefetchScalarGridSpec(
                num_scalar_prefetch=0,
                grid=(grid0,),
                in_specs=[
                    io_spec(),                                          # x tile
                    io_spec(),                                          # y tile
                    pl.BlockSpec(memory_space=pltpu.MemorySpace.VMEM),  # gamma (resident)
                    pl.BlockSpec(memory_space=pltpu.MemorySpace.VMEM),  # beta  (resident)
                ],
                out_specs=pl.BlockSpec((rb, H), lambda i: (i, 0)),
            ),
            compiler_params=pltpu.CompilerParams(
                dimension_semantics=("parallel",),
                vmem_limit_bytes=vmem_limit,
            ),
        )(x2, y2, g2, b2)

    try:
        out2 = _run(in_bufs)
    except Exception:
        if in_bufs <= 2:
            raise
        out2 = _run(2)  # safe fallback to default double-buffering

    return out2.reshape(orig_shape)


# --------------------------------------------------------------------------- #
# Reference + demo
# --------------------------------------------------------------------------- #
def _reference(x, y, gamma, beta):
    u = x - jnp.maximum(y, 0.0)
    mean = jnp.mean(u, axis=-1, keepdims=True)
    var = jnp.mean((u - mean) ** 2, axis=-1, keepdims=True)
    return (u - mean) / jnp.sqrt(var + LN_EPS) * gamma + beta


if __name__ == "__main__":
    B, S, H = 2, 8, 32  # input_shape[-1] == H for the LayerNorm

    key = jax.random.PRNGKey(0)
    kx, ky, kg, kb = jax.random.split(key, 4)
    x = jax.random.normal(kx, (B, S, H), dtype=jnp.float32)
    y = jax.random.normal(ky, (B, S, H), dtype=jnp.float32)
    gamma = 1.0 + 0.1 * jax.random.normal(kg, (H,), dtype=jnp.float32)
    beta = 0.1 * jax.random.normal(kb, (H,), dtype=jnp.float32)

    # Basic shape.
    out = jax.block_until_ready(residual_decomp(x, y, gamma, beta))
    ref = _reference(x, y, gamma, beta)
    assert jnp.allclose(out, ref, atol=1e-5, rtol=1e-5), "mismatch vs reference"

    # Ragged tail (rows % row_block != 0): handled by Pallas partial last block,
    # no pad/slice HBM round trip.
    x3, y3 = x[:, :5, :], y[:, :5, :]
    out3 = jax.block_until_ready(residual_decomp(x3, y3, gamma, beta))
    assert jnp.allclose(out3, _reference(x3, y3, gamma, beta), atol=1e-5, rtol=1e-5)

    # Multi-step grid (>= 4 even steps) + ragged last block + deeper input buffering.
    kx2, ky2 = jax.random.split(ky)
    xb = jax.random.normal(kx2, (1000, H), dtype=jnp.float32)
    yb = jax.random.normal(ky2, (1000, H), dtype=jnp.float32)
    outb = jax.block_until_ready(residual_decomp(xb, yb, gamma, beta))
    assert jnp.allclose(outb, _reference(xb, yb, gamma, beta), atol=1e-5, rtol=1e-5)

    # bf16 I/O (16-bit elementwise path auto-enables only on small-VMEM / v7x chips).
    x16, y16 = x.astype(jnp.bfloat16), y.astype(jnp.bfloat16)
    out16 = jax.block_until_ready(residual_decomp(x16, y16, gamma, beta))
    ref16 = _reference(x16.astype(jnp.float32), y16.astype(jnp.float32), gamma, beta)
    assert jnp.allclose(out16.astype(jnp.float32), ref16, atol=5e-2, rtol=5e-2)

    print("KERNEL_OK")
</pallas_src>

<mosaic_0001>
module attributes {stable_mosaic.version = 11 : i64} {
  func.func @_kernel_f32(%arg0: i32, %arg1: memref<16x32xf32, #tpu.memory_space<vmem>>, %arg2: memref<16x32xf32, #tpu.memory_space<vmem>>, %arg3: memref<1x32xf32, #tpu.memory_space<vmem>>, %arg4: memref<1x32xf32, #tpu.memory_space<vmem>>, %arg5: memref<16x32xf32, #tpu.memory_space<vmem>>) attributes {dimension_semantics = [#tpu.dimension_semantics<parallel>], iteration_bounds = array<i64: 1>, scalar_prefetch = 0 : i64, scratch_operands = 0 : i64, tpu.core_type = #tpu.core_type<tc>, window_params = [{transform_indices = @transform_0, window_bounds = array<i64: 16, 32>}, {transform_indices = @transform_1, window_bounds = array<i64: 16, 32>}, {pipeline_mode = #tpu.pipeline_mode<synchronous>, transform_indices = @transform_2, window_bounds = array<i64: 1, 32>}, {pipeline_mode = #tpu.pipeline_mode<synchronous>, transform_indices = @transform_3, window_bounds = array<i64: 1, 32>}, {transform_indices = @transform_4, window_bounds = array<i64: 16, 32>}]} {
    %c0 = arith.constant 0 : index
    %c0_0 = arith.constant 0 : index
    %0 = vector.load %arg1[%c0, %c0_0] : memref<16x32xf32, #tpu.memory_space<vmem>>, vector<16x32xf32>
    %c0_1 = arith.constant 0 : index
    %c0_2 = arith.constant 0 : index
    %1 = vector.load %arg2[%c0_1, %c0_2] : memref<16x32xf32, #tpu.memory_space<vmem>>, vector<16x32xf32>
    %cst = arith.constant 0.000000e+00 : f32
    %2 = vector.broadcast %cst : f32 to vector<16x32xf32>
    %3 = arith.maximumf %1, %2 : vector<16x32xf32>
    %4 = arith.subf %0, %3 : vector<16x32xf32>
    %cst_3 = arith.constant dense<0.000000e+00> : vector<16xf32>
    %5 = vector.multi_reduction <add>, %4, %cst_3 [1] : vector<16x32xf32> to vector<16xf32>
    %6 = vector.shape_cast %5 : vector<16xf32> to vector<16x1xf32>
    %cst_4 = arith.constant 3.200000e+01 : f32
    %7 = vector.broadcast %cst_4 : f32 to vector<16x1xf32>
    %8 = arith.divf %6, %7 : vector<16x1xf32>
    %9 = vector.broadcast %8 : vector<16x1xf32> to vector<16x32xf32>
    %10 = arith.subf %4, %9 : vector<16x32xf32>
    %11 = arith.mulf %10, %10 : vector<16x32xf32>
    %cst_5 = arith.constant dense<0.000000e+00> : vector<16xf32>
    %12 = vector.multi_reduction <add>, %11, %cst_5 [1] : vector<16x32xf32> to vector<16xf32>
    %13 = vector.shape_cast %12 : vector<16xf32> to vector<16x1xf32>
    %cst_6 = arith.constant 3.200000e+01 : f32
    %14 = vector.broadcast %cst_6 : f32 to vector<16x1xf32>
    %15 = arith.divf %13, %14 : vector<16x1xf32>
    %cst_7 = arith.constant 9.99999974E-6 : f32
    %16 = vector.broadcast %cst_7 : f32 to vector<16x1xf32>
    %17 = arith.addf %15, %16 : vector<16x1xf32>
    %18 = math.rsqrt %17 : vector<16x1xf32>
    %19 = vector.broadcast %18 : vector<16x1xf32> to vector<16x32xf32>
    %20 = arith.mulf %10, %19 : vector<16x32xf32>
    %c0_8 = arith.constant 0 : index
    %c0_9 = arith.constant 0 : index
    %21 = vector.load %arg3[%c0_8, %c0_9] : memref<1x32xf32, #tpu.memory_space<vmem>>, vector<1x32xf32>
    %22 = vector.broadcast %21 : vector<1x32xf32> to vector<16x32xf32>
    %23 = arith.mulf %20, %22 : vector<16x32xf32>
    %c0_10 = arith.constant 0 : index
    %c0_11 = arith.constant 0 : index
    %24 = vector.load %arg4[%c0_10, %c0_11] : memref<1x32xf32, #tpu.memory_space<vmem>>, vector<1x32xf32>
    %25 = vector.broadcast %24 : vector<1x32xf32> to vector<16x32xf32>
    %26 = arith.addf %23, %25 : vector<16x32xf32>
    %c0_12 = arith.constant 0 : index
    %c0_13 = arith.constant 0 : index
    %27 = vector.load %arg5[%c0_12, %c0_13] : memref<16x32xf32, #tpu.memory_space<vmem>>, vector<16x32xf32>
    tpu.vector_store %arg5[%c0_12, %c0_13], %26 {strides = array<i32>} : memref<16x32xf32, #tpu.memory_space<vmem>>, vector<16x32xf32>,
    return
  }
  func.func @transform_0(%arg0: i32) -> (i32, i32) {
    %c0_i32 = arith.constant 0 : i32
    %c0_i32_0 = arith.constant 0 : i32
    return %arg0, %c0_i32 : i32, i32
  }
  func.func @transform_1(%arg0: i32) -> (i32, i32) {
    %c0_i32 = arith.constant 0 : i32
    %c0_i32_0 = arith.constant 0 : i32
    return %arg0, %c0_i32 : i32, i32
  }
  func.func @transform_2(%arg0: i32) -> (i32, i32) {
    %c0_i32 = arith.constant 0 : i32
    %c0_i32_0 = arith.constant 0 : i32
    %c0_i32_1 = arith.constant 0 : i32
    return %c0_i32, %c0_i32_0 : i32, i32
  }
  func.func @transform_3(%arg0: i32) -> (i32, i32) {
    %c0_i32 = arith.constant 0 : i32
    %c0_i32_0 = arith.constant 0 : i32
    %c0_i32_1 = arith.constant 0 : i32
    return %c0_i32, %c0_i32_0 : i32, i32
  }
  func.func @transform_4(%arg0: i32) -> (i32, i32) {
    %c0_i32 = arith.constant 0 : i32
    %c0_i32_0 = arith.constant 0 : i32
    return %arg0, %c0_i32 : i32, i32
  }
}

</mosaic_0001>

<bundles_post_ra>
// kernel: tpu_custom_call.1
= control target key start
LH: loop header
LB: loop body
LE: loop exit
PB: predicated region body
PF: predicated region fallthrough
CT: control target
= control target key end

     0   :  { %9 = vsyncpa [#allocation3], 0  ;;  %s290_s0 = inlined_call_operand.hbm [shape: f32[16,32], index: 0, kind: input, shape index: {}]   ;;  %s291_s1 = inlined_call_operand.hbm [shape: f32[16,32], index: 1, kind: input, shape index: {}]   ;;  %s292_s2 = inlined_call_operand.vmem [shape: f32[1,32], index: 2, kind: input, shape index: {}]   ;;  %s293_s3 = inlined_call_operand.vmem [shape: f32[1,32], index: 3, kind: input, shape index: {}]   ;;  %s294_s4 = inlined_call_operand.hbm [shape: f32[16,32], index: 4, kind: output, shape index: {}]  }
   0x1   :  { %10 = vsyncpa [#allocation6], 0 }
   0x2   :  { %11 = vsyncpa [#allocation4], 0  ;;  %s203_s15 = smov [#allocation2]   ;;  %s131_s19 = scalar_lea.hbm %s290_s0, 256 }
   0x3   :  { %s17_s16 = sshll.u32 %s203_s15, 4  ;;  %p132_p0 = scmp.ne.s32.totalorder %s290_s0, %s131_s19  ;;  %s18_s16 = int_to_ptr.vmem [resolvable:$true] %s17_s16 }
   0x4   :  { %p135_p1 = scmp.lt.u32.totalorder %s131_s19, %s290_s0 }
   0x6   :  { %p137_p2 = pnand %p135_p1, %p132_p0 }
   0x8   :  { %140 = shalt.err (!%p137_p2)
}
   0x9   :  { %s141_s24 = scalar_lea.vmem %s18_s16, 256  ;;  %p146_p4 = scmp.lt.s32.totalorder %s18_s16, %s18_s16 }
   0xa   :  { %p142_p3 = scmp.ne.s32.totalorder %s18_s16, %s141_s24  ;;  %p147_p5 = scmp.lt.s32.totalorder %s141_s24, %s141_s24 }
   0xc   :  { %p148_p6 = por %p147_p5, %p146_p4 }
   0xe   :  { %p149_p7 = pnand %p148_p6, %p142_p3 }
  0x10   :  { %152 = shalt.err (!%p149_p7)
}
  0x11   :  { %s204_s25 = smov 128   ;;  %s205_s26 = smov 8  }
  0x12   :  { %23 = dma.hbm_to_vmem [thread:$0]  %s290_s0, 256, %s18_s16, [#allocation3], %s204_s25, %s204_s25, %s205_s26  }
  0x13   :  { %s206_s29 = smov [#allocation5]   ;;  %s153_s7 = scalar_lea.hbm %s291_s1, 256 }
  0x14   :  { %s29_s30 = sshll.u32 %s206_s29, 4  ;;  %p154_p8 = scmp.ne.s32.totalorder %s291_s1, %s153_s7  ;;  %s30_s30 = int_to_ptr.vmem [resolvable:$true] %s29_s30 }
  0x15   :  { %p157_p9 = scmp.lt.u32.totalorder %s153_s7, %s291_s1 }
  0x17   :  { %p159_p10 = pnand %p157_p9, %p154_p8 }
  0x19   :  { %162 = shalt.err (!%p159_p10)
}
  0x1a   :  { %s163_s12 = scalar_lea.vmem %s30_s30, 256  ;;  %p168_p12 = scmp.lt.s32.totalorder %s30_s30, %s30_s30 }
  0x1b   :  { %p164_p11 = scmp.ne.s32.totalorder %s30_s30, %s163_s12  ;;  %p169_p13 = scmp.lt.s32.totalorder %s163_s12, %s163_s12 }
  0x1d   :  { %p170_p0 = por %p169_p13, %p168_p12 }
  0x1f   :  { %p171_p1 = pnand %p170_p0, %p164_p11 }
  0x21   :  { %174 = shalt.err (!%p171_p1)
}
  0x22   :  { %35 = dma.hbm_to_vmem [thread:$0]  %s291_s1, 256, %s30_s30, [#allocation6], %s204_s25, %s204_s25, %s205_s26  }
  0x23   :  { %197 = dma.done.wait [#allocation3], 256  }
  0x24   :  { %198 = vsyncadd [#allocation3], 4294967040 }
  0x25   :  { %199 = dma.done.wait [#allocation6], 256  }
  0x26   :  { %200 = vsyncadd [#allocation6], 4294967040  ;;  %v46_v0 = vld [vmem:[#allocation2] sm:$0xff]  ;;  %v48_v1 = vld [vmem:[#allocation5] sm:$0xff]  ;;  %vm54_vm0 = vcmask 261120   ;;  %s207_s17 = smov [#allocation7]  }
  0x27   :  { %v50_v2 = vmax.f32 %v48_v1, 0.0  ;;  %v47_v3 = vld [vmem:[#allocation2 + $0x8] sm:$0xff]  ;;  %v49_v4 = vld [vmem:[#allocation5 + $0x8] sm:$0xff]  ;;  %v120_v27 = vld [vmem:[%s292_s2] ss:$0 sm:$0xff]  ;;  %s107_s18 = sshll.u32 %s207_s17, 4  ;;  %s108_s18 = int_to_ptr.vmem [resolvable:$true] %s107_s18 }
  0x28   :  { %v51_v5 = vmax.f32 %v49_v4, 0.0  ;;  %v121_v29 = vld [vmem:[%s293_s3] ss:$0 sm:$0xff]  ;;  %s175_s19 = scalar_lea.vmem %s108_s18, 256  ;;  %p180_p3 = scmp.lt.s32.totalorder %s108_s18, %s108_s18 }
  0x29   :  { %v52_v6 = vsub.f32 %v46_v0, %v50_v2  ;;  %p176_p2 = scmp.ne.s32.totalorder %s108_s18, %s175_s19  ;;  %p181_p4 = scmp.lt.s32.totalorder %s175_s19, %s175_s19 }
  0x2a   :  { %v53_v7 = vsub.f32 %v47_v3, %v51_v5 }
  0x2b   :  { %v55_v8 = vsel %vm54_vm0, %v52_v6, 0.0  ;;  %p182_p5 = por %p181_p4, %p180_p3 }
  0x2c   :  { %56 = vadd.xlane.f32.xlu0 %v55_v8  ;;  %v58_v9 = vsel %vm54_vm0, %v53_v7, 0.0 }
  0x2d   :  { %p183_p6 = pnand %p182_p5, %p176_p2 }
  0x30   :  { %59 = vadd.xlane.f32.xlu0 %v58_v9 }
  0xb9   :  { %v57_v10 = vpop.xlane.xlu0 %56 }
  0xba   :  { %v62_v11 = vmul.f32 0.03125, %v57_v10 }
  0xbc   :  { %v64_v12 = vsub.f32 %v52_v6, %v62_v11 }
  0xbd   :  { %v60_v13 = vpop.xlane.xlu0 %59 }
  0xbe   :  { %v63_v14 = vmul.f32 0.03125, %v60_v13  ;;  %v66_v15 = vmul.f32 %v64_v12, %v64_v12 }
  0xc0   :  { %v65_v16 = vsub.f32 %v53_v7, %v63_v14  ;;  %v68_v17 = vsel %vm54_vm0, %v66_v15, 0.0 }
  0xc1   :  { %69 = vadd.xlane.f32.xlu1 %v68_v17 }
  0xc2   :  { %v67_v18 = vmul.f32 %v65_v16, %v65_v16 }
  0xc4   :  { %v71_v19 = vsel %vm54_vm0, %v67_v18, 0.0 }
  0xc5   :  { %72 = vadd.xlane.f32.xlu1 %v71_v19 }
 0x14e   :  { %v70_v20 = vpop.xlane.xlu1 %69 }
 0x14f   :  { %v74_v21 = vmul.f32 0.03125, %v70_v20 }
 0x151   :  { %v76_v22 = vadd.f32 1e-05, %v74_v21 }
 0x152   :  { %v73_v23 = vpop.xlane.xlu1 %72 }
 0x153   :  { %127 = vrsqrt.f32 %v76_v22  ;;  %v75_v24 = vmul.f32 0.03125, %v73_v23 }
 0x155   :  { %v77_v25 = vadd.f32 1e-05, %v75_v24 }
 0x157   :  { %129 = vrsqrt.f32 %v77_v25 }
 0x15d   :  { %v128_v26 = vpop.eup %127 }
 0x15e   :  { %v80_v28 = vmul.f32 %v128_v26, %v64_v12 }
 0x160   :  { %v89_v30 = vmul.f32 %v120_v27, %v80_v28 }
 0x161   :  { %v130_v31 = vpop.eup %129 }
 0x162   :  { %v81_v32 = vmul.f32 %v130_v31, %v65_v16  ;;  %v98_v33 = vadd.f32 %v121_v29, %v89_v30 }
 0x164   :  { %v90_v34 = vmul.f32 %v120_v27, %v81_v32  ;;  %100 = vst.msk [vmem:[#allocation7] sm:$0xff] %vm54_vm0, %v98_v33 }
 0x166   :  { %v99_v35 = vadd.f32 %v121_v29, %v90_v34 }
 0x168   :  { %101 = vst.msk [vmem:[#allocation7 + $0x8] sm:$0xff] %vm54_vm0, %v99_v35 }
 0x169   :  { %186 = shalt.err (!%p183_p6)
}
 0x16a   :  { %s187_s20 = scalar_lea.hbm %s294_s4, 256 }
 0x16b   :  { %p188_p7 = scmp.ne.s32.totalorder %s294_s4, %s187_s20  ;;  %p191_p8 = scmp.lt.u32.totalorder %s187_s20, %s294_s4 }
 0x16d   :  { %p193_p9 = pnand %p191_p8, %p188_p7 }
 0x16f   :  { %196 = shalt.err (!%p193_p9)
}
 0x170   :  { %113 = dma.vmem_to_hbm [thread:$0]  %s108_s18, 256, %s294_s4, [#allocation4], %s204_s25, %s204_s25, %s205_s26  }
 0x171   :  { %201 = dma.done.wait [#allocation4], 256  }
 0x172   :  { %202 = vsyncadd [#allocation4], 4294967040 }
 0x173   :  { %117 = vsyncpa [#allocation3], 1 }
 0x174   :  { %118 = vsyncpa [#allocation6], 1 }
 0x175   :  { %119 = vsyncpa [#allocation4], 1 }

</bundles_post_ra>
